<compile_context>
chip_gen: v5e
topology: v5e:2x2
jax: 0.10.0
libtpu: 0.0.40
codegen_flags: <defaults>
</compile_context>

<pallas_src>
import math
import functools

import jax
import jax.numpy as jnp
from jax import lax
from jax.experimental import pallas as pl
from jax.experimental.pallas import tpu as pltpu


# ---------------------------------------------------------------------------
# Activation
# ---------------------------------------------------------------------------

def _gelu_exact(x):
    # PyTorch F.gelu default ('none'): exact erf-based GELU.
    return 0.5 * x * (1.0 + lax.erf(x * (1.0 / math.sqrt(2.0))))


def _gelu_tanh(x):
    # tanh approximation: transcendental goes to the EUP slot (nearly free),
    # use when bit-parity with PyTorch's erf GELU is not required.
    c = math.sqrt(2.0 / math.pi)
    return 0.5 * x * (1.0 + jnp.tanh(c * (x + 0.044715 * x * x * x)))


# ---------------------------------------------------------------------------
# Kernel
# ---------------------------------------------------------------------------

def _mlp_kernel(x_ref, w1_ref, b1_ref, w2_ref, b2_ref, o_ref, *, approximate):
    # x_ref:  (Cin,  TM)   column tile of the (channels, spatial) slab
    # w1_ref: (Cmid, Cin)  mlp1 weight, used as-is (no transpose needed)
    # b1_ref: (Cmid, 1)
    # w2_ref: (Cout, Cmid) mlp2 weight, used as-is
    # b2_ref: (Cout, 1)
    # o_ref:  (Cout, TM)   lane-dense output tile
    #
    # Explicit MXU precision: full-f32 passes for f32 params (matches the
    # PyTorch f32 Conv2d reference); default single-pass bf16 MXU otherwise.
    prec = (lax.Precision.HIGHEST if w1_ref.dtype == jnp.float32
            else lax.Precision.DEFAULT)

    h = jnp.dot(w1_ref[...], x_ref[...],
                preferred_element_type=jnp.float32, precision=prec)
    h = h + b1_ref[...].astype(jnp.float32)
    h = _gelu_tanh(h) if approximate else _gelu_exact(h)

    # Feed the second matmul in the weights' dtype (deliberate: full-rate MXU
    # when weights are bf16); accumulate in f32.
    y = jnp.dot(w2_ref[...], h.astype(w2_ref.dtype),
                preferred_element_type=jnp.float32, precision=prec)
    o_ref[...] = (y + b2_ref[...].astype(jnp.float32)).astype(o_ref.dtype)


# ---------------------------------------------------------------------------
# Shape-aware tiling / VMEM budgeting
# ---------------------------------------------------------------------------

def _round_up(x, m):
    return ((x + m - 1) // m) * m


def _vmem_capacity_bytes():
    try:
        return int(pltpu.get_tpu_info().vmem_capacity_bytes)
    except Exception:
        return 64 * 1024 * 1024  # conservative fallback: v7x per-TC VMEM


def _step_footprint_bytes(Cin, Cmid, Cout, tm, act_itemsize, w_itemsize):
    act = 2 * (Cin + Cout) * tm * act_itemsize                     # double-buffered in/out tiles
    wgt = (Cmid * Cin + Cout * Cmid + Cmid + Cout) * w_itemsize    # single-buffered resident weights
    mid = 4 * Cmid * tm                                            # f32 intermediate tile
    return act + wgt + mid


def _largest_divisor_tile(HW, target):
    """Largest tm that divides HW, is a multiple of 128 and lies within
    [0.75*target, target].  None if no such divisor exists."""
    if HW % 128 != 0:
        return None
    best = None
    k = 1
    while HW // k >= 128:
        if HW % k == 0:
            tm = HW // k
            if tm % 128 == 0 and tm <= target and (best is None or tm > best):
                best = tm
        k += 1
    if best is not None and 4 * best >= 3 * target:
        return best
    return None


def _even_total_adjust(HW, B, tm):
    """Small odd grid totals leave one v7x TensorCore ~33% idle; nudge tm down
    (at most halving) so B*num_m is even.  No effect on 1-TC v5e/v6e."""
    total = B * pl.cdiv(HW, tm)
    if total % 2 == 0 or total >= 8:
        return tm
    cand = tm - 128
    floor_ = max(128, tm // 2)
    while cand >= floor_:
        if (B * pl.cdiv(HW, cand)) % 2 == 0:
            return cand
        cand -= 128
    return tm


def _choose_tiling(B, Cin, Cmid, Cout, HW, act_dtype, w_dtype, desired_tm):
    act_itemsize = jnp.dtype(act_dtype).itemsize
    w_itemsize = jnp.dtype(w_dtype).itemsize
    capacity = _vmem_capacity_bytes()
    budget = int(0.8 * capacity)

    def footprint(tm):
        return _step_footprint_bytes(Cin, Cmid, Cout, tm, act_itemsize, w_itemsize)

    hw128 = _round_up(HW, 128)
    tm = min(_round_up(max(desired_tm, 128), 128), hw128)

    # Shrink tile until the real per-step footprint (+25% headroom) fits
    # ~0.8x of this generation's VMEM (tm=512 is already ~85% of roofline,
    # so shrinking first costs ~1% while guaranteeing fit on v7x's 64 MiB).
    while tm > 128 and int(1.25 * footprint(tm)) > budget:
        tm = max(128, _round_up(tm // 2, 128))

    # Prefer a 128-multiple divisor of HW within ~25% of tm: no masked tail
    # tile -> unmasked lane-dense stores on every stripe.
    div = _largest_divisor_tile(HW, tm)
    if div is not None:
        tm = div

    # Keep >= 2 grid steps so both v7x TensorCores get work.
    if B * pl.cdiv(HW, tm) < 2 and HW > 128:
        tm = _round_up(pl.cdiv(HW, 2), 128)
        div = _largest_divisor_tile(HW, tm)
        if div is not None:
            tm = div

    tm = _even_total_adjust(HW, B, tm)

    num_m = pl.cdiv(HW, tm)
    vmem_limit = int(min(max(1.25 * footprint(tm), 16 * 1024 * 1024),
                         0.9 * capacity))
    return tm, num_m, vmem_limit


# ---------------------------------------------------------------------------
# Wrapper
# ---------------------------------------------------------------------------

def mlp_forward(x_nchw, w1, b1, w2, b2, *, tm=1024, gelu_approximate=False):
    """x_nchw: [B, Cin, H, W]; w1: [Cmid, Cin]; b1: [Cmid]; w2: [Cout, Cmid]; b2: [Cout]."""
    B, Cin, H, W = x_nchw.shape
    Cmid = w1.shape[0]
    Cout = w2.shape[0]
    HW = H * W

    # Pure reshape (no HBM transpose, no pad copy): NCHW -> (B, Cin, H*W).
    x3d = x_nchw.reshape(B, Cin, HW)

    tm, num_m, vmem_limit = _choose_tiling(
        B, Cin, Cmid, Cout, HW, x_nchw.dtype, w1.dtype, tm)

    b1c = b1.reshape(Cmid, 1)
    b2c = b2.reshape(Cout, 1)

    act_itemsize = jnp.dtype(x_nchw.dtype).itemsize
    w_itemsize = jnp.dtype(w1.dtype).itemsize
    cost = pl.CostEstimate(
        flops=2 * B * HW * (Cin * Cmid + Cmid * Cout),
        transcendentals=B * HW * Cmid,
        bytes_accessed=(B * HW * (Cin + Cout) * act_itemsize
                        + (Cmid * Cin + Cout * Cmid + Cmid + Cout) * w_itemsize),
    )

    kernel = functools.partial(_mlp_kernel, approximate=gelu_approximate)

    out3d = pl.pallas_call(
        kernel,
        out_shape=jax.ShapeDtypeStruct((B, Cout, HW), x_nchw.dtype),
        grid_spec=pltpu.PrefetchScalarGridSpec(
            num_scalar_prefetch=0,
            grid=(B, num_m),
            in_specs=[
                # Activations: batch dim squeezed, channels on sublanes,
                # spatial columns on lanes.
                pl.BlockSpec((None, Cin, tm), lambda b, j: (b, 0, j)),
                # Weights/biases: constant block index -> resident in VMEM.
                # Single-buffered (the second pipeline buffer is never used).
                pl.BlockSpec((Cmid, Cin), lambda b, j: (0, 0),
                             pipeline_mode=pl.Buffered(1)),
                pl.BlockSpec((Cmid, 1), lambda b, j: (0, 0),
                             pipeline_mode=pl.Buffered(1)),
                pl.BlockSpec((Cout, Cmid), lambda b, j: (0, 0),
                             pipeline_mode=pl.Buffered(1)),
                pl.BlockSpec((Cout, 1), lambda b, j: (0, 0),
                             pipeline_mode=pl.Buffered(1)),
            ],
            out_specs=pl.BlockSpec((None, Cout, tm), lambda b, j: (b, 0, j)),
        ),
        compiler_params=pltpu.CompilerParams(
            dimension_semantics=("parallel", "parallel"),
            vmem_limit_bytes=vmem_limit,
        ),
        cost_estimate=cost,
    )(x3d, w1, b1c, w2, b2c)

    # Pure reshape back: (B, Cout, H*W) -> NCHW.
    return out3d.reshape(B, Cout, H, W)


def _init_conv1x1_params(key, in_ch, out_ch):
    """Deterministic init mimicking PyTorch Conv2d default (kaiming uniform, fan_in=in_ch)."""
    kw, kb = jax.random.split(key)
    bound = 1.0 / math.sqrt(in_ch)
    w = jax.random.uniform(kw, (out_ch, in_ch), jnp.float32, -bound, bound)
    b = jax.random.uniform(kb, (out_ch,), jnp.float32, -bound, bound)
    return w, b


if __name__ == "__main__":
    key = jax.random.PRNGKey(0)
    k_x, k_w1, k_w2 = jax.random.split(key, 3)

    B, Cin, H, W = 2, 4, 16, 16
    Cmid, Cout = 32, 4

    x = jax.random.normal(k_x, (B, Cin, H, W), jnp.float32)
    w1, b1 = _init_conv1x1_params(k_w1, Cin, Cmid)   # mlp1: Conv2d(in, mid, 1)
    w2, b2 = _init_conv1x1_params(k_w2, Cmid, Cout)  # mlp2: Conv2d(mid, out, 1)

    out = mlp_forward(x, w1, b1, w2, b2)
    jax.block_until_ready(out)

    # Reference check in plain JAX (1x1 convs == channel matmuls), f32 throughout.
    x2d = jnp.transpose(x, (0, 2, 3, 1)).reshape(-1, Cin)
    h_ref = _gelu_exact(jnp.dot(x2d, w1.T, precision=lax.Precision.HIGHEST) + b1)
    y2d = jnp.dot(h_ref, w2.T, precision=lax.Precision.HIGHEST) + b2
    y_ref = y2d.reshape(B, H, W, Cout).transpose(0, 3, 1, 2)
    assert jnp.allclose(out, y_ref, atol=1e-5, rtol=1e-5), "mismatch vs reference"

    print("KERNEL_OK")
</pallas_src>

<mosaic_0001>
module attributes {stable_mosaic.version = 11 : i64} {
  func.func @_mlp_kernel(%arg0: i32, %arg1: i32, %arg2: memref<1x4x256xf32, #tpu.memory_space<vmem>>, %arg3: memref<32x4xf32, #tpu.memory_space<vmem>>, %arg4: memref<32x1xf32, #tpu.memory_space<vmem>>, %arg5: memref<4x32xf32, #tpu.memory_space<vmem>>, %arg6: memref<4x1xf32, #tpu.memory_space<vmem>>, %arg7: memref<1x4x256xf32, #tpu.memory_space<vmem>>) attributes {dimension_semantics = [#tpu.dimension_semantics<parallel>, #tpu.dimension_semantics<parallel>], iteration_bounds = array<i64: 2, 1>, scalar_prefetch = 0 : i64, scratch_operands = 0 : i64, tpu.core_type = #tpu.core_type<tc>, window_params = [{transform_indices = @transform_0, window_bounds = array<i64: 1, 4, 256>}, {pipeline_mode = #tpu.pipeline_mode<synchronous>, transform_indices = @transform_1, window_bounds = array<i64: 32, 4>}, {pipeline_mode = #tpu.pipeline_mode<synchronous>, transform_indices = @transform_2, window_bounds = array<i64: 32, 1>}, {pipeline_mode = #tpu.pipeline_mode<synchronous>, transform_indices = @transform_3, window_bounds = array<i64: 4, 32>}, {pipeline_mode = #tpu.pipeline_mode<synchronous>, transform_indices = @transform_4, window_bounds = array<i64: 4, 1>}, {transform_indices = @transform_5, window_bounds = array<i64: 1, 4, 256>}]} {
    %c0 = arith.constant 0 : index
    %c0_0 = arith.constant 0 : index
    %0 = vector.load %arg3[%c0, %c0_0] : memref<32x4xf32, #tpu.memory_space<vmem>>, vector<32x4xf32>
    %c0_1 = arith.constant 0 : index
    %c0_2 = arith.constant 0 : index
    %c0_3 = arith.constant 0 : index
    %1 = vector.load %arg2[%c0_1, %c0_2, %c0_3] : memref<1x4x256xf32, #tpu.memory_space<vmem>>, vector<1x4x256xf32>
    %2 = vector.shape_cast %1 : vector<1x4x256xf32> to vector<4x256xf32>
    %cst = arith.constant dense<0.000000e+00> : vector<32x256xf32>
    %3 = tpu.matmul %0, %2, %cst {dimension_numbers = #tpu.dot_dimension_numbers<[1], [0], [0], [1], [0, 0, 1, 1], [], []>, precision = #tpu.contract_precision<fp32>} : vector<32x4xf32>, vector<4x256xf32>, vector<32x256xf32> -> vector<32x256xf32>
    %c0_4 = arith.constant 0 : index
    %c0_5 = arith.constant 0 : index
    %4 = vector.load %arg4[%c0_4, %c0_5] : memref<32x1xf32, #tpu.memory_space<vmem>>, vector<32x1xf32>
    %5 = vector.broadcast %4 : vector<32x1xf32> to vector<32x256xf32>
    %6 = arith.addf %3, %5 : vector<32x256xf32>
    %cst_6 = arith.constant 5.000000e-01 : f32
    %7 = vector.broadcast %cst_6 : f32 to vector<32x256xf32>
    %8 = arith.mulf %7, %6 : vector<32x256xf32>
    %cst_7 = arith.constant 0.707106769 : f32
    %9 = vector.broadcast %cst_7 : f32 to vector<32x256xf32>
    %10 = arith.mulf %6, %9 : vector<32x256xf32>
    %11 = math.erf %10 : vector<32x256xf32>
    %cst_8 = arith.constant 1.000000e+00 : f32
    %12 = vector.broadcast %cst_8 : f32 to vector<32x256xf32>
    %13 = arith.addf %12, %11 : vector<32x256xf32>
    %14 = arith.mulf %8, %13 : vector<32x256xf32>
    %c0_9 = arith.constant 0 : index
    %c0_10 = arith.constant 0 : index
    %15 = vector.load %arg5[%c0_9, %c0_10] : memref<4x32xf32, #tpu.memory_space<vmem>>, vector<4x32xf32>
    %cst_11 = arith.constant dense<0.000000e+00> : vector<4x256xf32>
    %16 = tpu.matmul %15, %14, %cst_11 {dimension_numbers = #tpu.dot_dimension_numbers<[1], [0], [0], [1], [0, 0, 1, 1], [], []>, precision = #tpu.contract_precision<fp32>} : vector<4x32xf32>, vector<32x256xf32>, vector<4x256xf32> -> vector<4x256xf32>
    %c0_12 = arith.constant 0 : index
    %c0_13 = arith.constant 0 : index
    %17 = vector.load %arg6[%c0_12, %c0_13] : memref<4x1xf32, #tpu.memory_space<vmem>>, vector<4x1xf32>
    %18 = vector.broadcast %17 : vector<4x1xf32> to vector<4x256xf32>
    %19 = arith.addf %16, %18 : vector<4x256xf32>
    %c0_14 = arith.constant 0 : index
    %c0_15 = arith.constant 0 : index
    %c0_16 = arith.constant 0 : index
    %20 = vector.load %arg7[%c0_14, %c0_15, %c0_16] : memref<1x4x256xf32, #tpu.memory_space<vmem>>, vector<1x4x256xf32>
    %21 = vector.shape_cast %20 : vector<1x4x256xf32> to vector<4x256xf32>
    %22 = vector.shape_cast %19 : vector<4x256xf32> to vector<1x4x256xf32>
    tpu.vector_store %arg7[%c0_14, %c0_15, %c0_16], %22 {strides = array<i32>} : memref<1x4x256xf32, #tpu.memory_space<vmem>>, vector<1x4x256xf32>,
    return
  }
  func.func @transform_0(%arg0: i32, %arg1: i32) -> (i32, i32, i32) {
    %c0_i32 = arith.constant 0 : i32
    %c0_i32_0 = arith.constant 0 : i32
    return %arg0, %c0_i32, %arg1 : i32, i32, i32
  }
  func.func @transform_1(%arg0: i32, %arg1: i32) -> (i32, i32) {
    %c0_i32 = arith.constant 0 : i32
    %c0_i32_0 = arith.constant 0 : i32
    %c0_i32_1 = arith.constant 0 : i32
    return %c0_i32, %c0_i32_0 : i32, i32
  }
  func.func @transform_2(%arg0: i32, %arg1: i32) -> (i32, i32) {
    %c0_i32 = arith.constant 0 : i32
    %c0_i32_0 = arith.constant 0 : i32
    %c0_i32_1 = arith.constant 0 : i32
    return %c0_i32, %c0_i32_0 : i32, i32
  }
  func.func @transform_3(%arg0: i32, %arg1: i32) -> (i32, i32) {
    %c0_i32 = arith.constant 0 : i32
    %c0_i32_0 = arith.constant 0 : i32
    %c0_i32_1 = arith.constant 0 : i32
    return %c0_i32, %c0_i32_0 : i32, i32
  }
  func.func @transform_4(%arg0: i32, %arg1: i32) -> (i32, i32) {
    %c0_i32 = arith.constant 0 : i32
    %c0_i32_0 = arith.constant 0 : i32
    %c0_i32_1 = arith.constant 0 : i32
    return %c0_i32, %c0_i32_0 : i32, i32
  }
  func.func @transform_5(%arg0: i32, %arg1: i32) -> (i32, i32, i32) {
    %c0_i32 = arith.constant 0 : i32
    %c0_i32_0 = arith.constant 0 : i32
    return %arg0, %c0_i32, %arg1 : i32, i32, i32
  }
}

</mosaic_0001>

<bundles_post_ra>
// kernel: tpu_custom_call.1
= control target key start
LH: loop header
LB: loop body
LE: loop exit
PB: predicated region body
PF: predicated region fallthrough
CT: control target
= control target key end

     0   :  { %10 = vsyncpa [#allocation3], 0  ;;  %s2388_s0 = inlined_call_operand.vmem [shape: f32[2,4,256], index: 0, kind: input, shape index: {}]   ;;  %s2389_s1 = inlined_call_operand.vmem [shape: f32[32,4], index: 1, kind: input, shape index: {}]   ;;  %s2390_s2 = inlined_call_operand.vmem [shape: f32[32,1], index: 2, kind: input, shape index: {}]   ;;  %s2391_s3 = inlined_call_operand.vmem [shape: f32[4,32], index: 3, kind: input, shape index: {}]   ;;  %s2392_s4 = inlined_call_operand.vmem [shape: f32[4,1], index: 4, kind: input, shape index: {}]   ;;  %s2393_s5 = inlined_call_operand.hbm [shape: f32[2,4,256], index: 5, kind: output, shape index: {}]  }
   0x1   :  { %12 = vsyncpa [#allocation3 + $0x1], 0  ;;  %s1826_s18 = smov 0   ;;  %s1828_s19 = smov 0  }
   0x2   :  { %s1830_s20 = smov 0   ;;  %s1832_s21 = smov 0  }
   0x3   :  { %s1834_s22 = smov 0   ;;  %s1836_s23 = smov 0  }
   0x4 LB: > { %s1617_s24 = sadd.s32 4294967295, %s1793_s23   ;;  %s1618_s25 = sadd.s32 4294967294, %s1793_s23   ;;  %s1793_s23 = sphi %s1836_s23, %s18_s23   ;;  %s1789_s22 = sphi %s1834_s22, %s2408_s22   ;;  %s1785_s21 = sphi %s1832_s21, %s2407_s21   ;;  %s1781_s20 = sphi %s1830_s20, %s2406_s20   ;;  %s1777_s19 = sphi %s1828_s19, %s2405_s19   ;;  %s1773_s18 = sphi %s1826_s18, %s2404_s18  }
   0x5   : > { %s30_s26 = sadd.s32 1, %s1789_s22  ;;  %s151_s27 = sadd.s32 1, %s1781_s20 }
   0x6   : > { %p32_p0 = scmp.ge.s32.totalorder %s30_s26, 2  ;;  %p161_p1 = scmp.ne.s32.totalorder %s1781_s20, %s1777_s19 }
   0x7   : > { %p162_p2 = scmp.eq.s32.totalorder %s1617_s24, 1  ;;  %p167_p3 = scmp.ne.s32.totalorder %s1777_s19, %s1773_s18 }
   0x8   : > { %s2410_s26 = smov (%p32_p0, %s30_s26), 0  ;;  %p168_p5 = scmp.eq.s32.totalorder %s1618_s25, 1 }
   0x9   : > { %p1866_p4 = por %p162_p2, %p161_p1  ;;  %s146_s29 = ssub.s32 %s1789_s22, %s2410_s26 }
   0xa   : > { %p1621_p6 = scmp.ge.s32.totalorder %s1793_s23, 1  ;;  %p149_p7 = scmp.eq.s32.totalorder %s146_s29, 0 }
   0xb   : > { %p1873_p8 = por %p168_p5, %p167_p3  ;;  %p211_p9 = scmp.lt.s32.totalorder %s1793_s23, 3 }
   0xc   : > { %s1879_s6 = scalar_select %p149_p7, %s1781_s20, %s151_s27  }
   0xd   : > { %p212_p10 = pnand %p1621_p6, %p211_p9 }
   0xe   : > { %p244_p11 = scmp.lt.s32.totalorder (!%p212_p10), %s1785_s21, 1  ;;  %s1639_s25 = sshll.u32 (!%p212_p10), %s1785_s21, 3 }
   0xf   : > { %215 = sbr.rel (%p212_p10) target bundleno = 493 (0x1ed), region = 40  ;;  %s1536_s7 = scalar_lea.hbm (!%p212_p10), %s2393_s5, %s1639_s25 }
  0x10   : > { %s1540_s10 = sshll.u32 (!%p212_p10), %s1536_s7, 4  ;;  %s1735_s15 = scalar_lea.hbm (!%p212_p10), %s2393_s5, 16  ;;  %s1541_s10 = int_to_ptr.hbm [resolvable:$true] %s1540_s10 }
  0x11   : > { %s1729_s11 = sshra.s32 (!%p212_p10), %s1541_s10, 4  ;;  %s1730_s11 = int_to_ptr.hbm [resolvable:$true] %s1729_s11 }
  0x12   : > { %s1731_s12 = scalar_lea.hbm (!%p212_p10), %s1730_s11, 8  ;;  %p1736_p1 = scmp.lt.s32.totalorder (!%p212_p10), %s1730_s11, %s2393_s5 }
  0x13   : > { %p1732_p12 = scmp.ne.s32.totalorder (!%p212_p10), %s1730_s11, %s1731_s12  ;;  %p1737_p2 = scmp.lt.s32.totalorder (!%p212_p10), %s1735_s15, %s1731_s12 }
  0x14   : > { %v254_v0 = vld [vmem:[%s2389_s1] sm:$0xff]  ;;  %vm287_vm0 = vcmask 31744   ;;  %v1795_v2 = vmov 0   ;;  %v255_v3 = vld [vmem:[%s2389_s1 + $0x8] sm:$0xff]  ;;  %s245_s13 = scalar_select %p244_p11, %s1785_s21, 1  ;;  %v256_v11 = vld [vmem:[%s2389_s1 + $0x10] sm:$0xff] }
  0x15   : > { %v289_v1 = vsel %vm287_vm0, %v254_v0, 0  ;;  %1697 = vset.pattern.permute.xlu1 %v1795_v2  ;;  %v260_v4 = vld [vmem:[%s2390_s2 + $0x8] sm:$0xff]  ;;  %1696 = vset.pattern.permute.xlu0 %v1795_v2  ;;  %v292_v7 = vsel %vm287_vm0, %v255_v3, 0  ;;  %v259_v12 = vld [vmem:[%s2390_s2] sm:$0xff]  ;;  %v295_v13 = vsel %vm287_vm0, %v256_v11, 0  ;;  %v262_v16 = vld [vmem:[%s2390_s2 + $0x18] sm:$0xff]  ;;  %p1733_p13 = pnand %p1732_p12, %p1866_p4  ;;  %p1738_p3 = por %p1737_p2, %p1736_p1 }
  0x16   : > { %v1893_v5 = vand.u32 4294901760, %v289_v1  ;;  %270 = vperm.xlu1 %1697, %v260_v4   ;;  %1698 = vset.pattern.permute.xlu2 %v1795_v2  ;;  %s1638_s14 = sshll.u32 %s245_s13, 3  ;;  %v1905_v10 = vand.u32 4294901760, %v292_v7  ;;  %vm300_vm1 = vcmask 1043456   ;;  %v1922_v17 = vand.u32 4294901760, %v295_v13  ;;  %v257_v26 = vld [vmem:[%s2389_s1 + $0x18] sm:$0xff] }
  0x17   : > { %s251_s17 = scalar_lea.vmem %s2388_s0, %s1638_s14  ;;  %280 = vperm.xlu0 %1696, %v262_v16   ;;  %v261_v31 = vld [vmem:[%s2390_s2 + $0x10] sm:$0xff]  ;;  %v298_v34 = vsel %vm287_vm0, %v257_v26, 0  ;;  %p1734_p0 = pneg %p1733_p13 }
  0x18   : > { %v1896_v6 = vsub.f32 %v289_v1, %v1893_v5  ;;  %v258_v8 = vld [vmem:[%s251_s17] sm:$0xff]  ;;  %v1917_v15 = vsub.f32 %v292_v7, %v1905_v10  ;;  %v1936_v30 = vsub.f32 %v295_v13, %v1922_v17  ;;  %v346_v39 = vand.u32 4294901760, %v298_v34  ;;  %s240_s17 = sand.u32 1, %s1777_s19  }
  0x19   : > { %284 = vst [vmem:[#allocation1] ss:$2 sm:$0xff] %v258_v8  ;;  %s1622_s24 = sshll.u32 %s240_s17, 3  ;;  %s1523_s21 = scalar_lea.sflag [#allocation3], %s240_s17 }
  0x1a   : > { %v1903_v9 = vand.u32 4294901760, %v1896_v6  ;;  %v1927_v23 = vand.u32 4294901760, %v1917_v15  ;;  %v340_v38 = vand.u32 4294901760, %v1936_v30  ;;  %v347_v43 = vsub.f32 %v298_v34, %v346_v39  ;;  %s242_s8 = scalar_lea.vmem [#allocation2], %s1622_s24  ;;  %p1739_p5 = pnand %p1738_p3, %p1734_p0 }
  0x1b   : > { %s1538_s9 = sshll.u32 %s242_s8, 4  ;;  %s1539_s9 = int_to_ptr.vmem [resolvable:$true] %s1538_s9 }
  0x1c   : > { %v325_v14 = vsub.f32 %v1896_v6, %v1903_v9  ;;  %v333_v29 = vsub.f32 %v1917_v15, %v1927_v23  ;;  %v341_v42 = vsub.f32 %v1936_v30, %v340_v38  ;;  %v348_v45 = vand.u32 4294901760, %v347_v43 }
  0x1e   : > { %265 = vperm.xlu1 %1697, %v259_v12   ;;  %v326_v21 = vand.u32 4294901760, %v325_v14  ;;  %v334_v37 = vand.u32 4294901760, %v333_v29  ;;  %v342_v44 = vand.u32 4294901760, %v341_v42  ;;  %v349_v46 = vsub.f32 %v347_v43, %v348_v45 }
  0x1f   : > { %275 = vperm.xlu0 %1696, %v261_v31  }
  0x20   : > { %v285_v18 = vld.sshfl [vmem:[#allocation1] sm:$0xff pattern:$0x75316420]  ;;  %v286_v19 = vld.sshfl [vmem:[#allocation1 + $0x8] sm:$0xff pattern:$0x75316420] }
  0x21   : > { %v301_v20 = vsel %vm300_vm1, %v285_v18, 0  ;;  %v303_v22 = vsel %vm300_vm1, %v286_v19, 0  ;;  %v350_v47 = vand.u32 4294901760, %v349_v46 }
  0x22   : > { %v320_v24 = vand.u32 4294901760, %v301_v20  ;;  %v559_v25 = vand.u32 4294901760, %v303_v22 }
  0x24   : > { %321 = vmatpush.msra.mxu0 %v320_v24  ;;  %v371_v27 = vsub.f32 %v301_v20, %v320_v24  ;;  %448 = vmatpush.msra.mxu3 %v320_v24  ;;  %v610_v28 = vsub.f32 %v303_v22, %v559_v25 }
  0x25   : > { %327 = vmatmul.f32.vlgmr.msra.gmra.mxu0 %v326_v21  ;;  %452 = vmatmul.f32.vlgmr.msra.gmra.mxu3 %v1903_v9 }
  0x26   : > { %410 = vmatpush.msra.mxu2 %v371_v27  ;;  %v372_v32 = vand.u32 4294901760, %v371_v27  ;;  %v611_v33 = vand.u32 4294901760, %v610_v28 }
  0x27   : > { %413 = vmatmul.f32.vlgmr.msra.gmra.mxu2 %v1896_v6 }
  0x28   : > { %560 = vmatpush.msrb.mxu2 %v559_v25  ;;  %v373_v35 = vsub.f32 %v371_v27, %v372_v32  ;;  %492 = vmatpush.msrb.mxu0 %v372_v32  ;;  %v612_v36 = vsub.f32 %v610_v28, %v611_v33 }
  0x2a   : > { %731 = vmatpush.msra.mxu2 %v611_v33  ;;  %649 = vmatpush.msra.mxu0 %v610_v28  ;;  %v374_v40 = vand.u32 4294901760, %v373_v35  ;;  %v613_v41 = vand.u32 4294901760, %v612_v36 }
  0x2c   : > { %375 = vmatpush.msra.mxu1 %v374_v40  ;;  %614 = vmatpush.msrb.mxu3 %v613_v41 }
  0x2d   : > { %335 = vmatmul.f32.gmra.mxu0 %v334_v37  ;;  %377 = vmatmul.f32.vlgmr.msra.gmra.mxu1 %v1893_v5 }
  0x2e   : > { %526 = vmatpush.msrb.mxu1 %v320_v24  ;;  %458 = vmatmul.f32.gmra.mxu3 %v1927_v23 }
  0x2f   : > { %418 = vmatmul.f32.gmra.mxu2 %v1917_v15  ;;  %765 = vmatpush.msra.mxu3 %v559_v25 }
  0x30   : > { %687 = vmatpush.msra.mxu1 %v559_v25 }
  0x35   : > { %343 = vmatmul.f32.gmra.mxu0 %v342_v44  ;;  %381 = vmatmul.f32.gmra.mxu1 %v1905_v10 }
  0x36   : > { %464 = vmatmul.f32.gmra.mxu3 %v340_v38 }
  0x37   : > { %423 = vmatmul.f32.gmra.mxu2 %v1936_v30 }
  0x3d   : > { %351 = vmatmul.f32.gmra.mxu0 %v350_v47  ;;  %385 = vmatmul.f32.gmra.mxu1 %v1922_v17 }
  0x3e   : > { %470 = vmatmul.f32.gmra.mxu3 %v348_v45 }
  0x3f   : > { %428 = vmatmul.f32.gmra.mxu2 %v347_v43 }
  0x45   : > { %389 = vmatmul.f32.gmra.mxu1 %v346_v39  ;;  %494 = vmatmul.f32.vlgmr.msrb.gmra.mxu0 %v1893_v5 }
  0x46   : > { %616 = vmatmul.f32.vlgmr.msrb.gmra.mxu3 %v1893_v5 }
  0x47   : > { %566 = vmatmul.f32.vlgmr.msrb.gmra.mxu2 %v326_v21 }
  0x4d   : > { %498 = vmatmul.f32.gmra.mxu0 %v1905_v10  ;;  %528 = vmatmul.f32.vlgmr.msrb.gmra.mxu1 %v1893_v5 }
  0x4e   : > { %620 = vmatmul.f32.gmra.mxu3 %v1905_v10 }
  0x4f   : > { %574 = vmatmul.f32.gmra.mxu2 %v334_v37 }
  0x55   : > { %502 = vmatmul.f32.gmra.mxu0 %v1922_v17  ;;  %532 = vmatmul.f32.gmra.mxu1 %v1905_v10 }
  0x56   : > { %624 = vmatmul.f32.gmra.mxu3 %v1922_v17 }
  0x57   : > { %582 = vmatmul.f32.gmra.mxu2 %v342_v44 }
  0x5d   : > { %506 = vmatmul.f32.gmra.mxu0 %v346_v39  ;;  %536 = vmatmul.f32.gmra.mxu1 %v1922_v17 }
  0x5e   : > { %628 = vmatmul.f32.gmra.mxu3 %v346_v39 }
  0x5f   : > { %590 = vmatmul.f32.gmra.mxu2 %v350_v47 }
  0x65   : > { %540 = vmatmul.f32.gmra.mxu1 %v346_v39  ;;  %652 = vmatmul.f32.vlgmr.msra.gmra.mxu0 %v1896_v6 }
  0x66   : > { %767 = vmatmul.f32.vlgmr.msra.gmra.mxu3 %v1893_v5 }
  0x67   : > { %733 = vmatmul.f32.vlgmr.msra.gmra.mxu2 %v1893_v5 }
  0x6d   : > { %657 = vmatmul.f32.gmra.mxu0 %v1917_v15  ;;  %691 = vmatmul.f32.vlgmr.msra.gmra.mxu1 %v1903_v9 }
  0x6e   : > { %771 = vmatmul.f32.gmra.mxu3 %v1905_v10 }
  0x6f   : > { %737 = vmatmul.f32.gmra.mxu2 %v1905_v10 }
  0x75   : > { %662 = vmatmul.f32.gmra.mxu0 %v1936_v30  ;;  %697 = vmatmul.f32.gmra.mxu1 %v1927_v23 }
  0x76   : > { %775 = vmatmul.f32.gmra.mxu3 %v1922_v17 }
  0x77   : > { %741 = vmatmul.f32.gmra.mxu2 %v1922_v17 }
  0x7d   : > { %667 = vmatmul.f32.gmra.mxu0 %v347_v43  ;;  %703 = vmatmul.f32.gmra.mxu1 %v340_v38 }
  0x7e   : > { %779 = vmatmul.f32.gmra.mxu3 %v346_v39 }
  0x7f   : > { %745 = vmatmul.f32.gmra.mxu2 %v346_v39 }
  0x85   : > { %709 = vmatmul.f32.gmra.mxu1 %v348_v45 }
  0x88   : > { %v1971_v53 = vpop.permute.xlu1 %270 }
  0x89   : > { %v1976_v0 = vpop.permute.xlu0 %280 }
  0x90   : > { %v1973_v58 = vpop.permute.xlu1 %265 }
  0x91   : > { %v1979_v10 = vpop.permute.xlu0 %275 }
  0xa2   : > { %v328_v48 = vpop.f32.mrf.mxu0 }
  0xa3   : > { %v329_v62 = vadd.f32 %v328_v48, %v1973_v58 }
  0xa8   : > { %v453_v49 = vpop.f32.mrf.mxu3 }
  0xaa   : > { %v336_v50 = vpop.f32.mrf.mxu0  ;;  %v378_v51 = vpop.f32.mrf.mxu1 }
  0xab   : > { %v414_v52 = vpop.f32.mrf.mxu2  ;;  %v379_v1 = vadd.f32 %v378_v51, %v329_v62  ;;  %v337_v5 = vadd.f32 %v336_v50, %v1971_v53 }
  0xad   : > { %v415_v6 = vadd.f32 %v414_v52, %v379_v1 }
  0xaf   : > { %v454_v8 = vadd.f32 %v453_v49, %v415_v6 }
  0xb1   : > { %v459_v54 = vpop.f32.mrf.mxu3 }
  0xb2   : > { %v344_v55 = vpop.f32.mrf.mxu0  ;;  %v382_v56 = vpop.f32.mrf.mxu1 }
  0xb3   : > { %v419_v57 = vpop.f32.mrf.mxu2  ;;  %v383_v9 = vadd.f32 %v382_v56, %v337_v5  ;;  %v345_v16 = vadd.f32 %v344_v55, %v1979_v10 }
  0xb5   : > { %v420_v15 = vadd.f32 %v419_v57, %v383_v9 }
  0xb7   : > { %v460_v20 = vadd.f32 %v459_v54, %v420_v15 }
  0xb9   : > { %v465_v59 = vpop.f32.mrf.mxu3 }
  0xba   : > { %v352_v60 = vpop.f32.mrf.mxu0  ;;  %v386_v61 = vpop.f32.mrf.mxu1 }
  0xbb   : > { %v424_v63 = vpop.f32.mrf.mxu2  ;;  %v387_v21 = vadd.f32 %v386_v61, %v345_v16  ;;  %v353_v25 = vadd.f32 %v352_v60, %v1976_v0 }
  0xbd   : > { %v425_v28 = vadd.f32 %v424_v63, %v387_v21 }
  0xbf   : > { %v466_v37 = vadd.f32 %v465_v59, %v425_v28 }
  0xc1   : > { %v471_v2 = vpop.f32.mrf.mxu3 }
  0xc2   : > { %v390_v3 = vpop.f32.mrf.mxu1  ;;  %v495_v4 = vpop.f32.mrf.mxu0 }
  0xc3   : > { %v429_v7 = vpop.f32.mrf.mxu2  ;;  %v496_v11 = vadd.f32 %v495_v4, %v454_v8  ;;  %v391_v38 = vadd.f32 %v390_v3, %v353_v25 }
  0xc5   : > { %v430_v46 = vadd.f32 %v429_v7, %v391_v38 }
  0xc7   : > { %v472_v61 = vadd.f32 %v471_v2, %v430_v46 }
  0xc9   : > { %v1981_v12 = vpop.f32.mrf.mxu3 }
  0xca   : > { %v499_v13 = vpop.f32.mrf.mxu0  ;;  %v529_v14 = vpop.f32.mrf.mxu1 }
  0xcb   : > { %v1984_v17 = vadd.f32 %v529_v14, %v496_v11  ;;  %v567_v18 = vpop.f32.mrf.mxu2  ;;  %v500_v23 = vadd.f32 %v499_v13, %v460_v20 }
  0xcc   : > { %v568_v25 = vadd.f32 %v567_v18, %v1973_v58 }
  0xcd   : > { %v1987_v19 = vmul.f32 0.70710677, %v1984_v17 }
  0xce   : > { %v618_v58 = vadd.f32 %v1981_v12, %v568_v25 }
  0xcf   : > { %v799_v22 = vmul.f32 %v1987_v19, %v1987_v19 }
  0xd1   : > { %v1991_v24 = vmin.f32 %v799_v22, 16.0  ;;  %v1994_v27 = vpop.f32.mrf.mxu3 }
  0xd2   : > { %v533_v26 = vpop.f32.mrf.mxu1  ;;  %v503_v31 = vpop.f32.mrf.mxu0 }
  0xd3   : > { %v801_v29 = vmul.f32 2.1237322e-06, %v1991_v24  ;;  %v812_v30 = vmul.f32 3.8918573e-05, %v1991_v24  ;;  %v1998_v32 = vadd.f32 %v533_v26, %v500_v23  ;;  %v2000_v33 = vpop.f32.mrf.mxu2  ;;  %v504_v43 = vadd.f32 %v503_v31, %v466_v37 }
  0xd5   : > { %v802_v34 = vadd.f32 0.00028619796, %v801_v29  ;;  %v813_v35 = vadd.f32 0.001143296, %v812_v30  ;;  %v2003_v36 = vmul.f32 0.70710677, %v1998_v32 }
  0xd7   : > { %v814_v39 = vmul.f32 %v813_v35, %v1991_v24  ;;  %v879_v40 = vmul.f32 %v2003_v36, %v2003_v36  ;;  %v803_v41 = vmul.f32 %v802_v34, %v1991_v24 }
  0xd9   : > { %v815_v42 = vadd.f32 0.014752088, %v814_v39  ;;  %v2009_v44 = vmin.f32 %v879_v40, 16.0  ;;  %v804_v52 = vadd.f32 0.0036580483, %v803_v41  ;;  %v2018_v56 = vpop.f32.mrf.mxu3 }
  0xda   : > { %v537_v45 = vpop.f32.mrf.mxu1  ;;  %v507_v55 = vpop.f32.mrf.mxu0 }
  0xdb   : > { %v816_v47 = vmul.f32 %v815_v42, %v1991_v24  ;;  %v2012_v48 = vadd.f32 %v537_v45, %v504_v43  ;;  %v2014_v49 = vpop.f32.mrf.mxu2  ;;  %v881_v50 = vmul.f32 2.1237322e-06, %v2009_v44  ;;  %v892_v51 = vmul.f32 3.8918573e-05, %v2009_v44 }
  0xdc   : > { %v508_v5 = vadd.f32 %v507_v55, %v472_v61  ;;  %v805_v6 = vmul.f32 %v804_v52, %v1991_v24 }
  0xdd   : > { %v817_v54 = vadd.f32 0.112945676, %v816_v47  ;;  %v882_v57 = vadd.f32 0.00028619796, %v881_v50  ;;  %v893_v59 = vadd.f32 0.001143296, %v892_v51  ;;  %v576_v51 = vadd.f32 %v2000_v33, %v1971_v53 }
  0xde   : > { %v2021_v60 = vmul.f32 0.70710677, %v2012_v48  ;;  %v806_v23 = vadd.f32 0.05243302, %v805_v6 }
  0xdf   : > { %v818_v62 = vmul.f32 %v817_v54, %v1991_v24  ;;  %v883_v63 = vmul.f32 %v882_v57, %v2009_v44  ;;  %v894_v1 = vmul.f32 %v893_v59, %v2009_v44 }
  0xe0   : > { %v959_v3 = vmul.f32 %v2021_v60, %v2021_v60  ;;  %v807_v39 = vmul.f32 %v806_v23, %v1991_v24  ;;  %v2079_v23 = vmul.f32 0.5, %v1998_v32 }
  0xe1   : > { %v819_v4 = vadd.f32 0.4994258, %v818_v62  ;;  %v895_v7 = vadd.f32 0.014752088, %v894_v1  ;;  %v884_v14 = vadd.f32 0.0036580483, %v883_v63  ;;  %v2046_v30 = vpop.f32.mrf.mxu3 }
  0xe2   : > { %v2029_v8 = vmin.f32 %v959_v3, 16.0  ;;  %v541_v9 = vpop.f32.mrf.mxu1  ;;  %v653_v29 = vpop.f32.mrf.mxu0  ;;  %v808_v57 = vadd.f32 0.18741608, %v807_v39 }
  0xe3   : > { %v820_v11 = vmul.f32 %v819_v4, %v1991_v24  ;;  %v2032_v2 = vadd.f32 %v541_v9, %v508_v5  ;;  %v2034_v13 = vpop.f32.mrf.mxu2  ;;  %v896_v15 = vmul.f32 %v895_v7, %v2009_v44  ;;  %v885_v31 = vmul.f32 %v884_v14, %v2009_v44 }
  0xe4   : > { %v961_v16 = vmul.f32 2.1237322e-06, %v2029_v8  ;;  %v972_v21 = vmul.f32 3.8918573e-05, %v2029_v8  ;;  %v654_v47 = vadd.f32 %v653_v29, %v618_v58  ;;  %v622_v5 = vadd.f32 %v1994_v27, %v576_v51 }
  0xe5   : > { %v2038_v20 = vadd.f32 1.0, %v820_v11  ;;  %v2042_v22 = vmul.f32 0.70710677, %v2032_v2  ;;  %v897_v26 = vadd.f32 0.112945676, %v896_v15  ;;  %v809_v11 = vmul.f32 %v808_v57, %v1991_v24 }
  0xe6   : > { %v962_v28 = vadd.f32 0.00028619796, %v961_v16  ;;  %v973_v37 = vadd.f32 0.001143296, %v972_v21  ;;  %v886_v43 = vadd.f32 0.05243302, %v885_v31  ;;  %v584_v24 = vadd.f32 %v2014_v49, %v1979_v10 }
  0xe7   : > { %1699 = vrcp.f32 %v2038_v20  ;;  %v898_v34 = vmul.f32 %v897_v26, %v2009_v44  ;;  %v1039_v38 = vmul.f32 %v2042_v22, %v2042_v22  ;;  %v810_v39 = vadd.f32 1.1283791, %v809_v11 }
  0xe8   : > { %v963_v35 = vmul.f32 %v962_v28, %v2029_v8  ;;  %v974_v41 = vmul.f32 %v973_v37, %v2029_v8  ;;  %v887_v33 = vmul.f32 %v886_v43, %v2009_v44  ;;  %vm827_vm2 = vweird.f32 %v2038_v20 }
  0xe9   : > { %v899_v18 = vadd.f32 0.4994258, %v898_v34  ;;  %v2056_v42 = vmin.f32 %v1039_v38, 16.0  ;;  %v768_v9 = vpop.f32.mrf.mxu3  ;;  %v833_v49 = vand.u32 2147483648, %v2038_v20  ;;  %v626_v57 = vadd.f32 %v2018_v56, %v584_v24 }
  0xea   : > { %v692_v40 = vpop.f32.mrf.mxu1  ;;  %v964_v46 = vadd.f32 0.0036580483, %v963_v35  ;;  %v975_v52 = vadd.f32 0.014752088, %v974_v41  ;;  %v658_v7 = vpop.f32.mrf.mxu0  ;;  %v888_v34 = vadd.f32 0.18741608, %v887_v33  ;;  %v592_v56 = vadd.f32 %v2034_v13, %v1976_v0 }
  0xeb   : > { %v900_v45 = vmul.f32 %v899_v18, %v2009_v44  ;;  %v1041_v54 = vmul.f32 2.1237322e-06, %v2056_v42  ;;  %v1052_v12 = vmul.f32 3.8918573e-05, %v2056_v42  ;;  %v734_v55 = vpop.f32.mrf.mxu2  ;;  %v693_v62 = vadd.f32 %v692_v40, %v654_v47 }
  0xec   : > { %v976_v63 = vmul.f32 %v975_v52, %v2029_v8  ;;  %v965_v53 = vmul.f32 %v964_v46, %v2029_v8  ;;  %v659_v31 = vadd.f32 %v658_v7, %v622_v5  ;;  %v831_v47 = vand.u32 2147483647, %v2038_v20 }
  0xed   : > { %v2059_v50 = vpop.eup %1699  ;;  %v2067_v61 = vadd.f32 1.0, %v900_v45  ;;  %v1042_v1 = vadd.f32 0.00028619796, %v1041_v54  ;;  %v1053_v3 = vadd.f32 0.001143296, %v1052_v12  ;;  %v735_v16 = vadd.f32 %v734_v55, %v693_v62 }
  0xee   : > { %v823_v59 = vmul.f32 %v2059_v50, %v2038_v20  ;;  %v977_v6 = vadd.f32 0.112945676, %v976_v63  ;;  %v966_v28 = vadd.f32 0.05243302, %v965_v53  ;;  %vm828_vm3 = vweird.f32 %v2059_v50 }
  0xef   : > { %1701 = vrcp.f32 %v2067_v61  ;;  %v1043_v14 = vmul.f32 %v1042_v1, %v2056_v42  ;;  %v1054_v15 = vmul.f32 %v1053_v3, %v2056_v42  ;;  %v2084_v37 = vadd.f32 %v768_v9, %v735_v16  ;;  %vm2105_vm4 = vmor %vm827_vm2, %vm828_vm3 }
  0xf0   : > { %v824_v4 = vsub.f32 1.0, %v823_v59  ;;  %v978_v25 = vmul.f32 %v977_v6, %v2029_v8  ;;  %v967_v43 = vmul.f32 %v966_v28, %v2029_v8  ;;  %v889_v51 = vmul.f32 %v888_v34, %v2009_v44 }
  0xf1   : > { %v1044_v27 = vadd.f32 0.0036580483, %v1043_v14  ;;  %v1055_v29 = vadd.f32 0.014752088, %v1054_v15  ;;  %v2101_v54 = vmul.f32 0.70710677, %v2084_v37  ;;  %v811_v5 = vmul.f32 %v810_v39, %v1987_v19 }
  0xf2   : > { %v825_v21 = vmul.f32 %v2059_v50, %v824_v4  ;;  %v698_v26 = vpop.f32.mrf.mxu1  ;;  %v979_v35 = vadd.f32 0.4994258, %v978_v25  ;;  %v663_v3 = vpop.f32.mrf.mxu0  ;;  %v834_v53 = vor.u32 1.1754944e-38, %v833_v49  ;;  %v968_v33 = vadd.f32 0.18741608, %v967_v43 }
  0xf3   : > { %v1056_v32 = vmul.f32 %v1055_v29, %v2056_v42  ;;  %v699_v58 = vadd.f32 %v698_v26, %v659_v31  ;;  %v1045_v41 = vmul.f32 %v1044_v27, %v2056_v42  ;;  %v738_v10 = vpop.f32.mrf.mxu2  ;;  %v839_v20 = vmul.f32 %v2101_v54, %v2101_v54  ;;  %v772_v4 = vpop.f32.mrf.mxu3 }
  0xf4   : > { %v826_v18 = vadd.f32 %v2059_v50, %v825_v21  ;;  %v980_v45 = vmul.f32 %v979_v35, %v2029_v8  ;;  %vm832_vm5 = vcmp.eq.f32.partialorder %v831_v47, 8.507059e+37  ;;  %v890_v6 = vadd.f32 1.1283791, %v889_v51 }
  0xf5   : > { %v2086_v38 = vpop.eup %1701  ;;  %v1057_v46 = vadd.f32 0.112945676, %v1056_v32  ;;  %v739_v62 = vadd.f32 %v738_v10, %v699_v58  ;;  %v1046_v1 = vadd.f32 0.05243302, %v1045_v41  ;;  %v911_v9 = vand.u32 2147483647, %v2067_v61 }
  0xf6   : > { %v903_v40 = vmul.f32 %v2086_v38, %v2067_v61  ;;  %v2109_v55 = vadd.f32 1.0, %v980_v45  ;;  %v830_v44 = vsel %vm2105_vm4, %v2059_v50, %v826_v18  ;;  %v2124_v11 = vmin.f32 %v839_v20, 16.0 }
  0xf7   : > { %v1058_v59 = vmul.f32 %v1057_v46, %v2056_v42  ;;  %v835_v7 = vsel %vm832_vm5, %v834_v53, %v830_v44  ;;  %v2126_v14 = vadd.f32 %v772_v4, %v739_v62  ;;  %vm908_vm6 = vweird.f32 %v2086_v38 }
  0xf8   : > { %v904_v52 = vsub.f32 1.0, %v903_v40  ;;  %1703 = vrcp.f32 %v2109_v55  ;;  %v1047_v16 = vmul.f32 %v1046_v1, %v2056_v42  ;;  %v913_v19 = vand.u32 2147483648, %v2067_v61 }
  0xf9   : > { %v1059_v50 = vadd.f32 0.4994258, %v1058_v59  ;;  %v969_v21 = vmul.f32 %v968_v33, %v2029_v8  ;;  %v852_v25 = vmul.f32 3.8918573e-05, %v2124_v11  ;;  %v664_v26 = vadd.f32 %v663_v3, %v626_v57 }
  0xfa   : > { %v905_v63 = vmul.f32 %v2086_v38, %v904_v52  ;;  %v704_v13 = vpop.f32.mrf.mxu1  ;;  %v836_v28 = vmul.f32 %v835_v7, %v811_v5  ;;  %vm907_vm7 = vweird.f32 %v2067_v61  ;;  %v2137_v27 = vmul.f32 0.5, %v2012_v48 }
  0xfb   : > { %v1060_v0 = vmul.f32 %v1059_v50, %v2056_v42  ;;  %vm2141_vm8 = vmor %vm907_vm7, %vm908_vm6  ;;  %v630_v35 = vadd.f32 %v2046_v30, %v592_v56  ;;  %v853_v24 = vadd.f32 0.001143296, %v852_v25  ;;  %v2147_v8 = vmul.f32 0.70710677, %v2126_v14  ;;  %v742_v18 = vpop.f32.mrf.mxu2  ;;  %v776_v51 = vpop.f32.mrf.mxu3 }
  0xfc   : > { %v906_v15 = vadd.f32 %v2086_v38, %v905_v63  ;;  %v705_v39 = vadd.f32 %v704_v13, %v664_v26  ;;  %v891_v32 = vmul.f32 %v890_v6, %v2003_v36  ;;  %v1048_v58 = vadd.f32 0.18741608, %v1047_v16  ;;  %v668_v36 = vpop.f32.mrf.mxu0 }
  0xfd   : > { %v2139_v29 = vadd.f32 1.0, %v1060_v0  ;;  %vm912_vm9 = vcmp.eq.f32.partialorder %v911_v9, 8.507059e+37  ;;  %v914_v40 = vor.u32 1.1754944e-38, %v913_v19  ;;  %v970_v41 = vadd.f32 1.1283791, %v969_v21 }
  0xfe   : > { %v1704_v31 = vpop.eup %1703  ;;  %v910_v48 = vsel %vm2141_vm8, %v2086_v38, %v906_v15  ;;  %v1625_v30 = vclamps-f32 %v836_v28, 1.0  ;;  %v991_v49 = vand.u32 2147483647, %v2109_v55  ;;  %v854_v43 = vmul.f32 %v853_v24, %v2124_v11 }
  0xff   : > { %v983_v61 = vmul.f32 %v1704_v31, %v2109_v55  ;;  %1705 = vrcp.f32 %v2139_v29  ;;  %v915_v45 = vsel %vm912_vm9, %v914_v40, %v910_v48  ;;  %v993_v46 = vand.u32 2147483648, %v2109_v55 }
 0x100   : > { %v919_v38 = vmul.f32 %v2147_v8, %v2147_v8  ;;  %v743_v47 = vadd.f32 %v742_v18, %v705_v39  ;;  %vm988_vm10 = vweird.f32 %v1704_v31  ;;  %v1049_v12 = vmul.f32 %v1048_v58, %v2056_v42 }
 0x101   : > { %v984_v10 = vsub.f32 1.0, %v983_v61  ;;  %v855_v57 = vadd.f32 0.014752088, %v854_v43  ;;  %v971_v59 = vmul.f32 %v970_v41, %v2021_v60  ;;  %vm987_vm11 = vweird.f32 %v2109_v55 }
 0x102   : > { %v2163_v62 = vmin.f32 %v919_v38, 16.0  ;;  %v669_v44 = vadd.f32 %v668_v36, %v630_v35  ;;  %v916_v63 = vmul.f32 %v915_v45, %v891_v32  ;;  %v2166_v3 = vadd.f32 %v776_v51, %v743_v47  ;;  %v710_v4 = vpop.f32.mrf.mxu1  ;;  %vm989_vm12 = vmor %vm987_vm11, %vm988_vm10 }
 0x103   : > { %v985_v52 = vmul.f32 %v1704_v31, %v984_v10  ;;  %v856_v20 = vmul.f32 %v855_v57, %v2124_v11  ;;  %v1119_v33 = vadd.f32 1.0, %v1625_v30  ;;  %vm992_vm13 = vcmp.eq.f32.partialorder %v991_v49, 8.507059e+37  ;;  %v746_v21 = vpop.f32.mrf.mxu2  ;;  %v780_v41 = vpop.f32.mrf.mxu3 }
 0x104   : > { %v994_v42 = vor.u32 1.1754944e-38, %v993_v46  ;;  %v932_v56 = vmul.f32 3.8918573e-05, %v2163_v62  ;;  %v1050_v5 = vadd.f32 1.1283791, %v1049_v12  ;;  %v711_v15 = vadd.f32 %v710_v4, %v669_v44 }
 0x105   : > { %v986_v1 = vadd.f32 %v1704_v31, %v985_v52  ;;  %v1706_v53 = vpop.eup %1705  ;;  %v841_v6 = vmul.f32 2.1237322e-06, %v2124_v11  ;;  %v857_v7 = vadd.f32 0.112945676, %v856_v20  ;;  %v1627_v16 = vclamps-f32 %v916_v63, 1.0 }
 0x106   : > { %v1063_v55 = vmul.f32 %v1706_v53, %v2139_v29  ;;  %v933_v9 = vadd.f32 0.001143296, %v932_v56  ;;  %v2172_v19 = vmul.f32 0.70710677, %v2166_v3  ;;  %v1071_v25 = vand.u32 2147483647, %v2139_v29 }
 0x107   : > { %v990_v60 = vsel %vm989_vm12, %v1704_v31, %v986_v1  ;;  %v1073_v26 = vand.u32 2147483648, %v2139_v29  ;;  %v858_v28 = vmul.f32 %v857_v7, %v2124_v11  ;;  %vm1068_vm14 = vweird.f32 %v1706_v53 }
 0x108   : > { %v995_v50 = vsel %vm992_vm13, %v994_v42, %v990_v60  ;;  %v1064_v13 = vsub.f32 1.0, %v1063_v55  ;;  %v934_v31 = vmul.f32 %v933_v9, %v2163_v62  ;;  %v999_v24 = vmul.f32 %v2172_v19, %v2172_v19 }
 0x109   : > { %v996_v0 = vmul.f32 %v995_v50, %v971_v59  ;;  %vm1067_vm15 = vweird.f32 %v2139_v29  ;;  %v842_v39 = vadd.f32 0.00028619796, %v841_v6  ;;  %v747_v48 = vadd.f32 %v746_v21, %v711_v15 }
 0x10a   : > { %v1065_v35 = vmul.f32 %v1706_v53, %v1064_v13  ;;  %v935_v32 = vadd.f32 0.014752088, %v934_v31  ;;  %v921_v18 = vmul.f32 2.1237322e-06, %v2163_v62  ;;  %v2182_v40 = vmin.f32 %v999_v24, 16.0  ;;  %vm1069_vm0 = vmor %vm1067_vm15, %vm1068_vm14 }
 0x10b   : > { %v1629_v34 = vclamps-f32 %v996_v0, 1.0  ;;  %v1121_v30 = vadd.f32 1.0, %v1627_v16  ;;  %v1074_v10 = vor.u32 1.1754944e-38, %v1073_v26  ;;  %v859_v49 = vadd.f32 0.4994258, %v858_v28 }
 0x10c   : > { %v1066_v58 = vadd.f32 %v1706_v53, %v1065_v35  ;;  %v936_v43 = vmul.f32 %v935_v32, %v2163_v62  ;;  %v1051_v36 = vmul.f32 %v1050_v5, %v2042_v22  ;;  %vm1072_vm2 = vcmp.eq.f32.partialorder %v1071_v25, 8.507059e+37 }
 0x10d   : > { %v1123_v61 = vadd.f32 1.0, %v1629_v34  ;;  %v1001_v29 = vmul.f32 2.1237322e-06, %v2182_v40  ;;  %v2188_v51 = vadd.f32 %v780_v41, %v747_v48  ;;  %v843_v12 = vmul.f32 %v842_v39, %v2124_v11 }
 0x10e   : > { %v1070_v45 = vsel %vm1069_vm0, %v1706_v53, %v1066_v58  ;;  %v937_v47 = vadd.f32 0.112945676, %v936_v43  ;;  %v922_v57 = vadd.f32 0.00028619796, %v921_v18  ;;  %v783_v59 = vmul.f32 0.5, %v1984_v17 }
 0x10f   : > { %v1131_v46 = vmul.f32 %v1123_v61, %v2137_v27  ;;  %v1075_v38 = vsel %vm1072_vm2, %v1074_v10, %v1070_v45  ;;  %v1129_v44 = vmul.f32 %v1121_v30, %v2079_v23  ;;  %v860_v22 = vmul.f32 %v859_v49, %v2124_v11 }
 0x110   : > { %v1076_v52 = vmul.f32 %v1075_v38, %v1051_v36  ;;  %v789_v63 = vmul.f32 0.5, %v2032_v2  ;;  %v938_v20 = vmul.f32 %v937_v47, %v2163_v62  ;;  %v1002_v27 = vadd.f32 0.00028619796, %v1001_v29 }
 0x111   : > { %v1127_v4 = vmul.f32 %v1119_v33, %v783_v59  ;;  %v2196_v53 = vand.u32 4294901760, %v1131_v46  ;;  %v1012_v42 = vmul.f32 3.8918573e-05, %v2182_v40  ;;  %v2200_v56 = vmul.f32 0.70710677, %v2188_v51 }
 0x112   : > { %v1631_v1 = vclamps-f32 %v1076_v52, 1.0  ;;  %v844_v17 = vadd.f32 0.0036580483, %v843_v12  ;;  %v923_v23 = vmul.f32 %v922_v57, %v2163_v62  ;;  %v939_v5 = vadd.f32 0.4994258, %v938_v20 }
 0x113   : > { %v2203_v55 = vand.u32 4294901760, %v1129_v44  ;;  %v2205_v2 = vadd.f32 1.0, %v860_v22  ;;  %v1013_v6 = vadd.f32 0.001143296, %v1012_v42  ;;  %v1079_v33 = vmul.f32 %v2200_v56, %v2200_v56 }
 0x114   : > { %v1125_v60 = vadd.f32 1.0, %v1631_v1  ;;  %v940_v7 = vmul.f32 %v939_v5, %v2163_v62  ;;  %v1003_v9 = vmul.f32 %v1002_v27, %v2182_v40  ;;  %v2211_v15 = vand.u32 4294901760, %v1127_v4 }
 0x115   : > { %v1014_v16 = vmul.f32 %v1013_v6, %v2182_v40  ;;  %v2214_v0 = vmin.f32 %v1079_v33, 16.0  ;;  %v1194_v13 = vsub.f32 %v1131_v46, %v2196_v53  ;;  %v845_v25 = vmul.f32 %v844_v17, %v2124_v11 }
 0x116   : > { %v1133_v50 = vmul.f32 %v1125_v60, %v789_v63  ;;  %v924_v26 = vadd.f32 0.0036580483, %v923_v23  ;;  %1707 = vrcp.f32 %v2205_v2  ;;  %v2221_v28 = vadd.f32 1.0, %v940_v7 }
 0x117   : > { %v1015_v31 = vadd.f32 0.014752088, %v1014_v16  ;;  %v1200_v34 = vsub.f32 %v1129_v44, %v2203_v55  ;;  %v1004_v24 = vadd.f32 0.0036580483, %v1003_v9  ;;  %v1081_v39 = vmul.f32 2.1237322e-06, %v2214_v0 }
 0x118   : > { %v2217_v21 = vand.u32 4294901760, %v1133_v50  ;;  %1709 = vrcp.f32 %v2221_v28  ;;  %v1206_v32 = vsub.f32 %v1127_v4, %v2211_v15  ;;  %v1195_v48 = vand.u32 4294901760, %v1194_v13 }
 0x119   : > { %v846_v61 = vadd.f32 0.05243302, %v845_v25  ;;  %v925_v58 = vmul.f32 %v924_v26, %v2163_v62  ;;  %v1016_v18 = vmul.f32 %v1015_v31, %v2182_v40  ;;  %v1082_v41 = vadd.f32 0.00028619796, %v1081_v39 }
 0x11a   : > { %v1188_v35 = vsub.f32 %v1133_v50, %v2217_v21  ;;  %1159 = vmatpush.msrb.mxu0 %v2217_v21  ;;  %1259 = vmatpush.msrb.mxu3 %v2217_v21  ;;  %v1092_v30 = vmul.f32 3.8918573e-05, %v2214_v0  ;;  %v1201_v49 = vand.u32 4294901760, %v1200_v34  ;;  %v1005_v43 = vmul.f32 %v1004_v24, %v2182_v40 }
 0x11b   : > { %v1017_v36 = vadd.f32 0.112945676, %v1016_v18  ;;  %v1196_v38 = vsub.f32 %v1194_v13, %v1195_v48  ;;  %v1207_v47 = vand.u32 4294901760, %v1206_v32  ;;  %v847_v52 = vmul.f32 %v846_v61, %v2124_v11 }
 0x11c   : > { %1161 = vmatpush.msrb.mxu0 %v2196_v53  ;;  %1230 = vmatpush.msrb.mxu2 %v1188_v35  ;;  %v1189_v10 = vand.u32 4294901760, %v1188_v35  ;;  %v2237_v45 = vpop.eup %1707  ;;  %v1093_v29 = vadd.f32 0.001143296, %v1092_v30  ;;  %v926_v12 = vadd.f32 0.05243302, %v925_v58  ;;  %v1083_v44 = vmul.f32 %v1082_v41, %v2214_v0 }
 0x11d   : > { %1261 = vmatpush.msrb.mxu3 %v2196_v53  ;;  %v1018_v57 = vmul.f32 %v1017_v36, %v2182_v40  ;;  %v1202_v1 = vsub.f32 %v1200_v34, %v1201_v49  ;;  %v863_v20 = vmul.f32 %v2237_v45, %v2205_v2  ;;  %v1006_v4 = vadd.f32 0.05243302, %v1005_v43 }
 0x11e   : > { %1163 = vmatpush.msrb.mxu0 %v2203_v55  ;;  %1233 = vmatpush.msrb.mxu2 %v1194_v13  ;;  %v1190_v46 = vsub.f32 %v1188_v35, %v1189_v10  ;;  %v2243_v59 = vpop.eup %1709  ;;  %v1094_v22 = vmul.f32 %v1093_v29, %v2214_v0  ;;  %v1197_v17 = vand.u32 4294901760, %v1196_v38  ;;  %v1208_v23 = vsub.f32 %v1206_v32, %v1207_v47  ;;  %v1135_v29 = vld [vmem:[%s2391_s3] sm:$0xf] }
 0x11f   : > { %1263 = vmatpush.msrb.mxu3 %v2203_v55  ;;  %v943_v27 = vmul.f32 %v2243_v59, %v2221_v28  ;;  %v1019_v42 = vadd.f32 0.4994258, %v1018_v57  ;;  %v848_v5 = vadd.f32 0.18741608, %v847_v52  ;;  %v927_v6 = vmul.f32 %v926_v12, %v2163_v62 }
 0x120   : > { %1165 = vmatpush.msrb.mxu0 %v2211_v15  ;;  %1236 = vmatpush.msrb.mxu2 %v1200_v34  ;;  %v1191_v63 = vand.u32 4294901760, %v1190_v46  ;;  %v1095_v60 = vadd.f32 0.014752088, %v1094_v22  ;;  %v1084_v50 = vadd.f32 0.0036580483, %v1083_v44  ;;  %v1203_v9 = vand.u32 4294901760, %v1202_v1 }
 0x121   : > { %1265 = vmatpush.msrb.mxu3 %v2211_v15  ;;  %v1020_v33 = vmul.f32 %v1019_v42, %v2182_v40  ;;  %v864_v16 = vsub.f32 1.0, %v863_v20  ;;  %v944_v13 = vsub.f32 1.0, %v943_v27  ;;  %v1007_v25 = vmul.f32 %v1006_v4, %v2182_v40 }
 0x122   : > { %1288 = vmatpush.msra.mxu0 %v1189_v10  ;;  %1239 = vmatpush.msrb.mxu2 %v1206_v32  ;;  %v1096_v7 = vmul.f32 %v1095_v60, %v2214_v0  ;;  %v1209_v34 = vand.u32 4294901760, %v1208_v23  ;;  %v849_v35 = vmul.f32 %v848_v5, %v2124_v11  ;;  %v928_v24 = vadd.f32 0.18741608, %v927_v6 }
 0x123   : > { %1192 = vmatpush.msrb.mxu1 %v1191_v63  ;;  %v2256_v26 = vadd.f32 1.0, %v1020_v33  ;;  %v1085_v39 = vmul.f32 %v1084_v50, %v2214_v0  ;;  %v945_v32 = vmul.f32 %v2243_v59, %v944_v13  ;;  %v865_v61 = vmul.f32 %v2237_v45, %v864_v16 }
 0x124   : > { %1292 = vmatpush.msra.mxu0 %v1195_v48  ;;  %v1097_v31 = vadd.f32 0.112945676, %v1096_v7  ;;  %v1008_v58 = vadd.f32 0.18741608, %v1007_v25  ;;  %v850_v18 = vadd.f32 1.1283791, %v849_v35  ;;  %vm867_vm3 = vweird.f32 %v2205_v2 }
 0x125   : > { %1198 = vmatpush.msrb.mxu1 %v1197_v17  ;;  %1711 = vrcp.f32 %v2256_v26  ;;  %v873_v11 = vand.u32 2147483648, %v2205_v2  ;;  %v929_v30 = vmul.f32 %v928_v24, %v2163_v62  ;;  %v951_v10 = vand.u32 2147483647, %v2221_v28 }
 0x126   : > { %1296 = vmatpush.msra.mxu0 %v1201_v49  ;;  %v1098_v48 = vmul.f32 %v1097_v31, %v2214_v0  ;;  %v953_v49 = vand.u32 2147483648, %v2221_v28  ;;  %v1086_v43 = vadd.f32 0.05243302, %v1085_v39  ;;  %vm948_vm4 = vweird.f32 %v2243_v59 }
 0x127   : > { %1204 = vmatpush.msrb.mxu1 %v1203_v9  ;;  %vm1142_vm5 = vcmask 261120   ;;  %v866_v62 = vadd.f32 %v2237_v45, %v865_v61  ;;  %vm868_vm6 = vweird.f32 %v2237_v45  ;;  %v1009_v46 = vmul.f32 %v1008_v58, %v2182_v40 }
 0x128   : > { %1300 = vmatpush.msra.mxu0 %v1207_v47  ;;  %v1099_v41 = vadd.f32 0.4994258, %v1098_v48  ;;  %v1144_v38 = vsel %vm1142_vm5, %v1135_v29, 0  ;;  %v871_v47 = vand.u32 2147483647, %v2205_v2  ;;  %v874_v52 = vor.u32 1.1754944e-38, %v873_v11  ;;  %vm2298_vm9 = vmor %vm867_vm3, %vm868_vm6 }
 0x129   : > { %1210 = vmatpush.msrb.mxu1 %v1209_v34  ;;  %vm947_vm7 = vweird.f32 %v2221_v28  ;;  %v930_v12 = vadd.f32 1.1283791, %v929_v30  ;;  %v1087_v44 = vmul.f32 %v1086_v43, %v2214_v0  ;;  %v2294_v22 = vand.u32 4294901760, %v1144_v38 }
 0x12a   : > { %v1100_v36 = vmul.f32 %v1099_v41, %v2214_v0  ;;  %vm2287_vm8 = vmor %vm947_vm7, %vm948_vm4  ;;  %vm952_vm10 = vcmp.eq.f32.partialorder %v951_v10, 8.507059e+37  ;;  %v954_v63 = vor.u32 1.1754944e-38, %v953_v49  ;;  %v870_v20 = vsel %vm2298_vm9, %v2237_v45, %v866_v62 }
 0x12b   : > { %1319 = vmatpush.msra.mxu1 %v2217_v21  ;;  %v946_v21 = vadd.f32 %v2243_v59, %v945_v32  ;;  %v1010_v27 = vadd.f32 1.1283791, %v1009_v46  ;;  %v1033_v4 = vand.u32 2147483648, %v2256_v26  ;;  %v1031_v42 = vand.u32 2147483647, %v2256_v26 }
 0x12c   : > { %v2292_v40 = vadd.f32 1.0, %v1100_v36  ;;  %1212 = vmatmul.f32.vlgmr.msrb.gmra.mxu1 %v2294_v22  ;;  %vm872_vm12 = vcmp.eq.f32.partialorder %v871_v47, 8.507059e+37  ;;  %v931_v60 = vmul.f32 %v930_v12, %v2147_v8  ;;  %v1088_v23 = vadd.f32 0.18741608, %v1087_v44 }
 0x12d   : > { %1321 = vmatpush.msra.mxu1 %v2196_v53  ;;  %v1712_v53 = vpop.eup %1711  ;;  %v875_v45 = vsel %vm872_vm12, %v874_v52, %v870_v20  ;;  %vm1027_vm13 = vweird.f32 %v2256_v26  ;;  %v851_v33 = vmul.f32 %v850_v18, %v2101_v54  ;;  %v1011_v50 = vmul.f32 %v1010_v27, %v2172_v19 }
 0x12e   : > { %1713 = vrcp.f32 %v2292_v40  ;;  %vm1028_vm11 = vweird.f32 %v1712_v53  ;;  %v1034_v7 = vor.u32 1.1754944e-38, %v1033_v4  ;;  %vm1032_vm15 = vcmp.eq.f32.partialorder %v1031_v42, 8.507059e+37 }
 0x12f   : > { %1323 = vmatpush.msra.mxu1 %v2203_v55  ;;  %v1023_v55 = vmul.f32 %v1712_v53, %v2256_v26  ;;  %vm1029_vm14 = vmor %vm1027_vm13, %vm1028_vm11  ;;  %v876_v25 = vmul.f32 %v875_v45, %v851_v33  ;;  %v1089_v31 = vmul.f32 %v1088_v23, %v2214_v0  ;;  %v1113_v61 = vand.u32 2147483648, %v2292_v40 }
 0x130   : > { %v1111_v0 = vand.u32 2147483647, %v2292_v40  ;;  %v788_v41 = vmul.f32 0.5, %v2166_v3  ;;  %vm1107_vm2 = vweird.f32 %v2292_v40  ;;  %v786_v49 = vmul.f32 0.5, %v2126_v14  ;;  %v1136_v3 = vld [vmem:[%s2392_s4] sm:$0xf] }
 0x131   : > { %1325 = vmatpush.msra.mxu1 %v2211_v15  ;;  %v950_v15 = vsel %vm2287_vm8, %v2243_v59, %v946_v21  ;;  %v1024_v1 = vsub.f32 1.0, %v1023_v55  ;;  %v2313_v59 = vsub.f32 %v1144_v38, %v2294_v22  ;;  %v1626_v32 = vclamps-f32 %v876_v25, 1.0  ;;  %1139 = vperm.xlu2 %1698, %v1136_v3  }
 0x132   : > { %v955_v17 = vsel %vm952_vm10, %v954_v63, %v950_v15  ;;  %v1090_v48 = vadd.f32 1.1283791, %v1089_v31  ;;  %v1114_v43 = vor.u32 1.1754944e-38, %v1113_v61  ;;  %vm1112_vm4 = vcmp.eq.f32.partialorder %v1111_v0, 8.507059e+37 }
 0x133   : > { %v1025_v2 = vmul.f32 %v1712_v53, %v1024_v1  ;;  %v2318_v6 = vand.u32 4294901760, %v2313_v59  ;;  %1242 = vmatmul.f32.vlgmr.msrb.gmra.mxu2 %v2313_v59  ;;  %v956_v9 = vmul.f32 %v955_v17, %v931_v60  ;;  %v1120_v10 = vadd.f32 1.0, %v1626_v32 }
 0x134   : > { %v1714_v13 = vpop.eup %1713  ;;  %1327 = vmatmul.f32.vlgmr.msra.gmra.mxu1 %v2294_v22  ;;  %v1091_v36 = vmul.f32 %v1090_v48, %v2200_v56  ;;  %v784_v62 = vmul.f32 0.5, %v2084_v37  ;;  %v790_v56 = vmul.f32 0.5, %v2188_v51 }
 0x135   : > { %v1026_v5 = vadd.f32 %v1712_v53, %v1025_v2  ;;  %v1169_v8 = vsub.f32 %v2313_v59, %v2318_v6  ;;  %1269 = vmatmul.f32.vlgmr.msrb.gmra.mxu3 %v2318_v6  ;;  %v1103_v54 = vmul.f32 %v1714_v13, %v2292_v40  ;;  %v1628_v19 = vclamps-f32 %v956_v9, 1.0 }
 0x136   : > { %vm1108_vm0 = vweird.f32 %v1714_v13  ;;  %v1128_v47 = vmul.f32 %v1120_v10, %v784_v62 }
 0x137   : > { %v1030_v16 = vsel %vm1029_vm14, %v1712_v53, %v1026_v5  ;;  %v2328_v35 = vand.u32 4294901760, %v1169_v8  ;;  %v1104_v39 = vsub.f32 1.0, %v1103_v54  ;;  %v1122_v11 = vadd.f32 1.0, %v1628_v19  ;;  %vm1109_vm3 = vmor %vm1107_vm2, %vm1108_vm0 }
 0x138   : > { %v1035_v26 = vsel %vm1032_vm15, %v1034_v7, %v1030_v16  ;;  %v1349_v57 = vand.u32 4294901760, %v1128_v47 }
 0x139   : > { %v1036_v34 = vmul.f32 %v1035_v26, %v1011_v50  ;;  %1171 = vmatmul.f32.vlgmr.msrb.gmra.mxu0 %v2328_v35  ;;  %v1105_v18 = vmul.f32 %v1714_v13, %v1104_v39  ;;  %v1130_v46 = vmul.f32 %v1122_v11, %v786_v49 }
 0x13a   : > { %v1391_v63 = vsub.f32 %v1128_v47, %v1349_v57 }
 0x13b   : > { %v1630_v24 = vclamps-f32 %v1036_v34, 1.0  ;;  %v1106_v30 = vadd.f32 %v1714_v13, %v1105_v18  ;;  %v1347_v55 = vand.u32 4294901760, %v1130_v46 }
 0x13c   : > { %v1392_v2 = vand.u32 4294901760, %v1391_v63 }
 0x13d   : > { %v1124_v58 = vadd.f32 1.0, %v1630_v24  ;;  %v1110_v29 = vsel %vm1109_vm3, %v1714_v13, %v1106_v30  ;;  %v1385_v28 = vsub.f32 %v1130_v46, %v1347_v55 }
 0x13e   : > { %v1115_v53 = vsel %vm1112_vm4, %v1114_v43, %v1110_v29  ;;  %v1393_v23 = vsub.f32 %v1391_v63, %v1392_v2 }
 0x13f   : > { %v1132_v21 = vmul.f32 %v1124_v58, %v788_v41  ;;  %v1116_v38 = vmul.f32 %v1115_v53, %v1091_v36  ;;  %v1386_v27 = vand.u32 4294901760, %v1385_v28 }
 0x140   : > { %v1394_v5 = vand.u32 4294901760, %v1393_v23 }
 0x141   : > { %1302 = vmatmul.f32.vlgmr.msra.gmra.mxu0 %v2294_v22  ;;  %v1345_v14 = vand.u32 4294901760, %v1132_v21  ;;  %v1632_v52 = vclamps-f32 %v1116_v38, 1.0  ;;  %v1387_v60 = vsub.f32 %v1385_v28, %v1386_v27 }
 0x143   : > { %v1126_v12 = vadd.f32 1.0, %v1632_v52  ;;  %v1379_v40 = vsub.f32 %v1132_v21, %v1345_v14  ;;  %v1388_v45 = vand.u32 4294901760, %v1387_v60 }
 0x145   : > { %v1134_v44 = vmul.f32 %v1126_v12, %v790_v56  ;;  %v1380_v1 = vand.u32 4294901760, %v1379_v40 }
 0x147   : > { %v1343_v37 = vand.u32 4294901760, %v1134_v44  ;;  %v1381_v51 = vsub.f32 %v1379_v40, %v1380_v1 }
 0x149   : > { %v1373_v15 = vsub.f32 %v1134_v44, %v1343_v37  ;;  %1344 = vmatpush.msra.mxu2 %v1343_v37  ;;  %1444 = vmatpush.msrb.mxu1 %v1343_v37  ;;  %v1382_v17 = vand.u32 4294901760, %v1381_v51 }
 0x14b   : > { %1346 = vmatpush.msra.mxu2 %v1345_v14  ;;  %1415 = vmatpush.msrb.mxu0 %v1373_v15  ;;  %v1374_v20 = vand.u32 4294901760, %v1373_v15 }
 0x14c   : > { %1446 = vmatpush.msrb.mxu1 %v1345_v14 }
 0x14d   : > { %1348 = vmatpush.msra.mxu2 %v1347_v55  ;;  %1418 = vmatpush.msrb.mxu0 %v1379_v40  ;;  %v1375_v4 = vsub.f32 %v1373_v15, %v1374_v20 }
 0x14e   : > { %1448 = vmatpush.msrb.mxu1 %v1347_v55 }
 0x14f   : > { %1350 = vmatpush.msra.mxu2 %v1349_v57  ;;  %1421 = vmatpush.msrb.mxu0 %v1385_v28  ;;  %v1376_v42 = vand.u32 4294901760, %v1375_v4 }
 0x150   : > { %1450 = vmatpush.msrb.mxu1 %v1349_v57  ;;  %1356 = vmatmul.f32.vlgmr.msra.gmra.mxu2 %v2328_v35 }
 0x151   : > { %1473 = vmatpush.msrb.mxu2 %v1374_v20  ;;  %1377 = vmatpush.msra.mxu3 %v1376_v42 }
 0x152   : > { %1424 = vmatpush.msrb.mxu0 %v1391_v63  ;;  %1454 = vmatmul.f32.vlgmr.msrb.gmra.mxu1 %v2318_v6 }
 0x153   : > { %1477 = vmatpush.msrb.mxu2 %v1380_v1  ;;  %1427 = vmatmul.f32.vlgmr.msrb.gmra.mxu0 %v2313_v59 }
 0x154   : > { %1383 = vmatpush.msra.mxu3 %v1382_v17 }
 0x155   : > { %1481 = vmatpush.msrb.mxu2 %v1386_v27 }
 0x156   : > { %1389 = vmatpush.msra.mxu3 %v1388_v45 }
 0x157   : > { %1485 = vmatpush.msrb.mxu2 %v1392_v2 }
 0x158   : > { %1395 = vmatpush.msra.mxu3 %v1394_v5  ;;  %1487 = vmatmul.f32.vlgmr.msrb.gmra.mxu2 %v2294_v22 }
 0x159   : > { %1397 = vmatmul.f32.vlgmr.msra.gmra.mxu3 %v2294_v22 }
 0x15a   : > { %1504 = vmatpush.msrb.mxu3 %v1343_v37 }
 0x15c   : > { %1506 = vmatpush.msrb.mxu3 %v1345_v14 }
 0x15e   : > { %1508 = vmatpush.msrb.mxu3 %v1347_v55 }
 0x160   : > { %1510 = vmatpush.msrb.mxu3 %v1349_v57 }
 0x161   : > { %1512 = vmatmul.f32.vlgmr.msrb.gmra.mxu3 %v2294_v22 }
 0x18b   : > { %v1140_v7 = vpop.permute.xlu2 %1139 }
 0x1a9   : > { %v1213_v33 = vpop.f32.mrf.mxu1 }
 0x1b1   : > { %v1328_v8 = vpop.f32.mrf.mxu1 }
 0x1b6   : > { %v1172_v59 = vpop.f32.mrf.mxu0  ;;  %v1243_v50 = vpop.f32.mrf.mxu2 }
 0x1b7   : > { %v1173_v16 = vadd.f32 %v1172_v59, %v1140_v7 }
 0x1b8   : > { %v1270_v6 = vpop.f32.mrf.mxu3 }
 0x1b9   : > { %v1214_v13 = vadd.f32 %v1213_v33, %v1173_v16 }
 0x1bb   : > { %v1244_v31 = vadd.f32 %v1243_v50, %v1214_v13 }
 0x1bd   : > { %v1271_v24 = vadd.f32 %v1270_v6, %v1244_v31 }
 0x1be   : > { %v1303_v9 = vpop.f32.mrf.mxu0 }
 0x1bf   : > { %v1304_v48 = vadd.f32 %v1303_v9, %v1271_v24 }
 0x1c1   : > { %v1329_v0 = vadd.f32 %v1328_v8, %v1304_v48 }
 0x1cf   : > { %v1455_v19 = vpop.f32.mrf.mxu1 }
 0x1d0   : > { %v1428_v54 = vpop.f32.mrf.mxu0 }
 0x1d3   : > { %v1357_v25 = vpop.f32.mrf.mxu2 }
 0x1d4   : > { %v1358_v26 = vadd.f32 %v1357_v25, %v1140_v7 }
 0x1db   : > { %v1488_v39 = vpop.f32.mrf.mxu2 }
 0x1dc   : > { %v1398_v34 = vpop.f32.mrf.mxu3 }
 0x1dd   : > { %v1399_v35 = vadd.f32 %v1398_v34, %v1358_v26 }
 0x1df   : > { %v1429_v22 = vadd.f32 %v1428_v54, %v1399_v35 }
 0x1e1   : > { %v1456_v32 = vadd.f32 %v1455_v19, %v1429_v22 }
 0x1e3   : > { %v1489_v61 = vadd.f32 %v1488_v39, %v1456_v32 }
 0x1e4   : > { %v1513_v58 = vpop.f32.mrf.mxu3 }
 0x1e5   : > { %v1514_v18 = vadd.f32 %v1513_v58, %v1489_v61 }
 0x1e7   : > { %v1518_v11 = vrot.slane %v1514_v18, 4 }
 0x1e9   : > { %v1519_v41 = vsel %vm300_vm1, %v1329_v0, %v1518_v11 }
 0x1ea   : > { %1521 = vst [vmem:[%s242_s8] sm:$0xff] %v1519_v41 }
 0x1eb   : > { %1742 = shalt.err (!%p1739_p5)
}
 0x1ec   : > { %1640 = dma.vmem_to_hbm [thread:$0]  (%p1866_p4), %s1539_s9, 128, %s1541_s10, %s1523_s21  }
 0x1ed PF: > { %p1646_p6 = scmp.ge.s32.totalorder %s1793_s23, 2  ;;  %s1552_s17 = sand.u32 1, %s1773_s18  }
 0x1ee   : > { %s1553_s25 = scalar_lea.sflag [#allocation3], %s1552_s17 }
 0x1ef   : > { %p1643_p7 = pnand %p1646_p6, %p1873_p8 }
 0x1f1   : > { %p1644_p9 = pneg %p1643_p7 }
 0x1f3   : > { %1768 = dma.done.wait (%p1644_p9), %s1553_s25, 128  }
 0x1f4   : > { %1770 = vsyncadd (%p1644_p9), %s1553_s25, 4294967168  ;;  %s18_s23 = sadd.s32 1, %s1793_s23   ;;  %s2404_s18 = smov %s1777_s19 }
 0x1f5   : > { %p15_p10 = scmp.ge.s32.totalorder %s18_s23, 4   ;;  %s2405_s19 = smov %s1781_s20 }
 0x1f6   : > { %s2406_s20 = smov %s1879_s6  ;;  %s2407_s21 = smov %s1789_s22 }
 0x1f7   : > { %s2408_s22 = smov %s2410_s26  ;;  %17 = sbr.rel (!%p15_p10) target bundleno = 4 (0x4), region = 75 }
 0x1fc   :  { %1559 = vsyncpa [#allocation3], 1 }
 0x1fd   :  { %1561 = vsyncpa [#allocation3 + $0x1], 1 }

</bundles_post_ra>
